<compile_context>
chip_gen: v5e
topology: v5e:2x2
jax: 0.10.0
libtpu: 0.0.40
codegen_flags: <defaults>
</compile_context>

<pallas_src>
import functools

import jax
import jax.numpy as jnp
from jax import lax
from jax.experimental import pallas as pl
from jax.experimental.pallas import tpu as pltpu

HIDDEN = 128          # fixed hidden dim of the gating MLP (as in the PyTorch module)
_NEG_INF = -1e30      # finite "-inf" for masked (padded) logits; avoids inf-inf NaNs


def _gated_mil_kernel(x_ref, vuw_ref, vub_ref, wwt_ref, wbt_ref,
                      z_ref, att_ref, m_sc, l_sc, acc_sc,
                      *, s_actual, s_tile, n_s_tiles):
    # x_ref: (1, s_tile, E)   vuw: (E, 256)   vub: (1, 256)
    # wwt:   (H, 128)         wbt: (H, 1)
    # z_ref: (1, H, E)        att_ref: (1, H, S_pad)  (resident across the S axis)
    s_idx = pl.program_id(1)

    @pl.when(s_idx == 0)
    def _init():
        m_sc[...] = jnp.full_like(m_sc, _NEG_INF)
        l_sc[...] = jnp.zeros_like(l_sc)
        acc_sc[...] = jnp.zeros_like(acc_sc)

    x = x_ref[0]                                              # (s_tile, E)

    # Fused gating projections: one (s_tile, E) x (E, 256) MXU matmul, then split.
    proj = jnp.dot(x, vuw_ref[...],
                   preferred_element_type=jnp.float32) + vub_ref[...]
    att_v = jnp.tanh(proj[:, :HIDDEN])                        # f32 elementwise
    att_u = jax.nn.sigmoid(proj[:, HIDDEN:])
    gated = att_v * att_u                                     # (s_tile, 128) f32

    # (H, 128) . (s_tile, 128)^T -> (H, s_tile): logits already "transposed".
    logits = lax.dot_general(
        wwt_ref[...], gated.astype(wwt_ref.dtype),
        dimension_numbers=(((1,), (1,)), ((), ())),
        preferred_element_type=jnp.float32) + wbt_ref[...]    # (H, s_tile) f32

    if s_actual != s_tile * n_s_tiles:                        # mask padded instances
        col = lax.broadcasted_iota(jnp.int32, logits.shape, 1) + s_idx * s_tile
        logits = jnp.where(col < s_actual, logits, _NEG_INF)

    # Stash raw (masked) logits into the resident att block; normalized at the end.
    if n_s_tiles == 1:
        att_ref[0] = logits.astype(att_ref.dtype)
    else:
        start = pl.multiple_of(s_idx * s_tile, s_tile)
        att_ref[0, :, pl.ds(start, s_tile)] = logits.astype(att_ref.dtype)

    # Online (flash-style) softmax accumulation of z = softmax(logits) @ x.
    m_prev = m_sc[...]
    m_new = jnp.maximum(m_prev, jnp.max(logits, axis=-1, keepdims=True))
    alpha = jnp.exp(m_prev - m_new)
    p = jnp.exp(logits - m_new)                               # (H, s_tile) f32
    l_sc[...] = alpha * l_sc[...] + jnp.sum(p, axis=-1, keepdims=True)
    acc_sc[...] = alpha * acc_sc[...] + jnp.dot(
        p.astype(x.dtype), x, preferred_element_type=jnp.float32)
    m_sc[...] = m_new

    @pl.when(s_idx == n_s_tiles - 1)
    def _finalize():
        inv_l = pl.reciprocal(l_sc[...], approx=False)        # exact softmax denom
        z_ref[0] = (acc_sc[...] * inv_l).astype(z_ref.dtype)
        logits_all = att_ref[0].astype(jnp.float32)           # (H, S_pad)
        att_ref[0] = (jnp.exp(logits_all - m_sc[...]) * inv_l).astype(att_ref.dtype)


def _round_up(v, m):
    return (v + m - 1) // m * m


def _vmem_budget(s_tile, s_pad, E, H):
    f32 = 4
    x_buf = 2 * s_tile * E * f32                              # double-buffered x tile
    w_buf = 2 * (E * 2 * HIDDEN + 2 * HIDDEN + H * HIDDEN + H) * f32
    out_buf = 2 * (H * E + H * s_pad) * f32
    scratch = (2 * H + H * E) * f32
    working = 3 * s_tile * 2 * HIDDEN * f32 + 2 * H * s_pad * f32
    est = x_buf + w_buf + out_buf + scratch + working + (8 << 20)
    return int(max(16 << 20, min(est, 48 << 20)))             # safe on v5e/v6e/v7x


def gated_mil_attention(x, params, *, mxu_dtype=None, s_tile_hint=512):
    """x: (B, S, E). Returns (z (B, H, E), att (B, H, S))."""
    B, S, E = x.shape
    vw, vb, uw, ub, ww, wb = params
    H = ww.shape[1]
    out_dtype = x.dtype

    # Fuse V|U into a single (E, 256) projection; pre-transpose w to (H, 128).
    vuw = jnp.concatenate([vw, uw], axis=1)                   # (E, 256)
    vub = jnp.concatenate([vb, ub], axis=0).reshape(1, 2 * HIDDEN)
    wwt = ww.T                                                # (H, 128)
    wbt = wb.reshape(H, 1)

    x_in = x
    if mxu_dtype is not None:                                 # bf16 MXU operands (v6e/v7x)
        x_in = x_in.astype(mxu_dtype)
        vuw = vuw.astype(mxu_dtype)
        wwt = wwt.astype(mxu_dtype)

    # Tile S so VMEM footprint is bounded regardless of bag size.
    if S <= s_tile_hint:
        s_tile = _round_up(S, 8)
    else:
        s_tile = s_tile_hint
    S_pad = _round_up(S, s_tile)
    n_s = S_pad // s_tile
    if S_pad != S:
        x_in = jnp.pad(x_in, ((0, 0), (0, S_pad - S), (0, 0)))

    kernel = functools.partial(
        _gated_mil_kernel, s_actual=S, s_tile=s_tile, n_s_tiles=n_s)

    const_spec = lambda shape: pl.BlockSpec(shape, lambda b, s: (0, 0))

    z, att = pl.pallas_call(
        kernel,
        out_shape=(
            jax.ShapeDtypeStruct((B, H, E), out_dtype),
            jax.ShapeDtypeStruct((B, H, S_pad), out_dtype),
        ),
        grid_spec=pltpu.PrefetchScalarGridSpec(
            num_scalar_prefetch=0,
            grid=(B, n_s),
            in_specs=[
                pl.BlockSpec((1, s_tile, E), lambda b, s: (b, s, 0)),  # x tile
                const_spec((E, 2 * HIDDEN)),                           # fused V|U weight
                const_spec((1, 2 * HIDDEN)),                           # fused V|U bias
                const_spec((H, HIDDEN)),                               # w weight (pre-T)
                const_spec((H, 1)),                                    # w bias
            ],
            out_specs=[
                pl.BlockSpec((1, H, E), lambda b, s: (b, 0, 0)),       # z (resident over s)
                pl.BlockSpec((1, H, S_pad), lambda b, s: (b, 0, 0)),   # att (resident over s)
            ],
            scratch_shapes=[
                pltpu.VMEM((H, 1), jnp.float32),     # running max
                pltpu.VMEM((H, 1), jnp.float32),     # running sum
                pltpu.VMEM((H, E), jnp.float32),     # z accumulator
            ],
        ),
        compiler_params=pltpu.CompilerParams(
            dimension_semantics=("parallel", "arbitrary"),
            vmem_limit_bytes=_vmem_budget(s_tile, S_pad, E, H)),
    )(x_in, vuw, vub, wwt, wbt)

    if S_pad != S:
        att = att[:, :, :S]
    return z, att


def init_params(key, embed_dim, num_heads):
    """Deterministic init mimicking nn.Linear's U(-1/sqrt(fan_in), 1/sqrt(fan_in))."""
    ks = jax.random.split(key, 6)

    def lin(kw, kb, fan_in, fan_out):
        bound = 1.0 / jnp.sqrt(fan_in)
        w = jax.random.uniform(kw, (fan_in, fan_out), jnp.float32, -bound, bound)
        b = jax.random.uniform(kb, (fan_out,), jnp.float32, -bound, bound)
        return w, b

    vw, vb = lin(ks[0], ks[1], embed_dim, HIDDEN)
    uw, ub = lin(ks[2], ks[3], embed_dim, HIDDEN)
    ww, wb = lin(ks[4], ks[5], HIDDEN, num_heads)
    return (vw, vb, uw, ub, ww, wb)


def reference(x, params):
    """Pure-JAX reference matching the PyTorch forward."""
    vw, vb, uw, ub, ww, wb = params
    att_v = jnp.tanh(x @ vw + vb)
    att_u = jax.nn.sigmoid(x @ uw + ub)
    att = (att_v * att_u) @ ww + wb                  # (B, S, H)
    att = jnp.swapaxes(att, -1, -2)                  # (B, H, S)
    att = jax.nn.softmax(att, axis=-1)
    z = att @ x                                      # (B, H, E)
    return z, att


if __name__ == "__main__":
    B, S, E, H = 2, 8, 32, 4
    key = jax.random.PRNGKey(0)
    kx, kp = jax.random.split(key)
    x = jax.random.normal(kx, (B, S, E), jnp.float32)
    params = init_params(kp, E, H)

    # f32 path: matches the PyTorch/JAX reference tightly.
    z, att = gated_mil_attention(x, params)
    jax.block_until_ready((z, att))

    z_ref, att_ref = reference(x, params)
    assert z.shape == (B, H, E) and att.shape == (B, H, S)
    assert jnp.allclose(z, z_ref, atol=1e-5, rtol=1e-5)
    assert jnp.allclose(att, att_ref, atol=1e-5, rtol=1e-5)

    # Optional bf16-MXU path (halves x HBM traffic; f32 accumulation/softmax).
    z_bf, att_bf = gated_mil_attention(x, params, mxu_dtype=jnp.bfloat16)
    jax.block_until_ready((z_bf, att_bf))
    assert z_bf.shape == (B, H, E) and att_bf.shape == (B, H, S)
    assert jnp.allclose(z_bf.astype(jnp.float32), z_ref, atol=0.1, rtol=0.1)
    assert jnp.allclose(att_bf.astype(jnp.float32), att_ref, atol=0.1, rtol=0.1)

    print("KERNEL_OK")
</pallas_src>

<mosaic_0001>
module attributes {stable_mosaic.version = 11 : i64} {
  func.func @_gated_mil_kernel(%arg0: i32, %arg1: i32, %arg2: memref<1x8x32xf32, #tpu.memory_space<vmem>>, %arg3: memref<32x256xf32, #tpu.memory_space<vmem>>, %arg4: memref<1x256xf32, #tpu.memory_space<vmem>>, %arg5: memref<4x128xf32, #tpu.memory_space<vmem>>, %arg6: memref<4x1xf32, #tpu.memory_space<vmem>>, %arg7: memref<1x4x32xf32, #tpu.memory_space<vmem>>, %arg8: memref<1x4x8xf32, #tpu.memory_space<vmem>>, %arg9: memref<4x1xf32, #tpu.memory_space<vmem>>, %arg10: memref<4x1xf32, #tpu.memory_space<vmem>>, %arg11: memref<4x32xf32, #tpu.memory_space<vmem>>) attributes {dimension_semantics = [#tpu.dimension_semantics<parallel>, #tpu.dimension_semantics<arbitrary>], iteration_bounds = array<i64: 2, 1>, scalar_prefetch = 0 : i64, scratch_operands = 3 : i64, tpu.core_type = #tpu.core_type<tc>, window_params = [{transform_indices = @transform_0, window_bounds = array<i64: 1, 8, 32>}, {pipeline_mode = #tpu.pipeline_mode<synchronous>, transform_indices = @transform_1, window_bounds = array<i64: 32, 256>}, {pipeline_mode = #tpu.pipeline_mode<synchronous>, transform_indices = @transform_2, window_bounds = array<i64: 1, 256>}, {pipeline_mode = #tpu.pipeline_mode<synchronous>, transform_indices = @transform_3, window_bounds = array<i64: 4, 128>}, {pipeline_mode = #tpu.pipeline_mode<synchronous>, transform_indices = @transform_4, window_bounds = array<i64: 4, 1>}, {transform_indices = @transform_5, window_bounds = array<i64: 1, 4, 32>}, {transform_indices = @transform_6, window_bounds = array<i64: 1, 4, 8>}]} {
    %c0_i32 = arith.constant 0 : i32
    %0 = arith.cmpi eq, %arg1, %c0_i32 : i32
    %1 = arith.extui %0 : i1 to i32
    %c0_i32_0 = arith.constant 0 : i32
    %2 = arith.cmpi ne, %1, %c0_i32_0 : i32
    scf.if %2 {
      %cst_33 = arith.constant -1.000000e+30 : f32
      %52 = vector.broadcast %cst_33 : f32 to vector<4x1xf32>
      %c0_34 = arith.constant 0 : index
      %c0_35 = arith.constant 0 : index
      %53 = vector.load %arg9[%c0_34, %c0_35] : memref<4x1xf32, #tpu.memory_space<vmem>>, vector<4x1xf32>
      tpu.vector_store %arg9[%c0_34, %c0_35], %52 {strides = array<i32>} : memref<4x1xf32, #tpu.memory_space<vmem>>, vector<4x1xf32>,
      %cst_36 = arith.constant 0.000000e+00 : f32
      %54 = vector.broadcast %cst_36 : f32 to vector<4x1xf32>
      %c0_37 = arith.constant 0 : index
      %c0_38 = arith.constant 0 : index
      %55 = vector.load %arg10[%c0_37, %c0_38] : memref<4x1xf32, #tpu.memory_space<vmem>>, vector<4x1xf32>
      tpu.vector_store %arg10[%c0_37, %c0_38], %54 {strides = array<i32>} : memref<4x1xf32, #tpu.memory_space<vmem>>, vector<4x1xf32>,
      %cst_39 = arith.constant 0.000000e+00 : f32
      %56 = vector.broadcast %cst_39 : f32 to vector<4x32xf32>
      %c0_40 = arith.constant 0 : index
      %c0_41 = arith.constant 0 : index
      %57 = vector.load %arg11[%c0_40, %c0_41] : memref<4x32xf32, #tpu.memory_space<vmem>>, vector<4x32xf32>
      tpu.vector_store %arg11[%c0_40, %c0_41], %56 {strides = array<i32>} : memref<4x32xf32, #tpu.memory_space<vmem>>, vector<4x32xf32>,
    } else {
    }
    %c0 = arith.constant 0 : index
    %c0_1 = arith.constant 0 : index
    %c0_2 = arith.constant 0 : index
    %3 = vector.load %arg2[%c0, %c0_1, %c0_2] : memref<1x8x32xf32, #tpu.memory_space<vmem>>, vector<1x8x32xf32>
    %4 = vector.shape_cast %3 : vector<1x8x32xf32> to vector<8x32xf32>
    %c0_3 = arith.constant 0 : index
    %c0_4 = arith.constant 0 : index
    %5 = vector.load %arg3[%c0_3, %c0_4] : memref<32x256xf32, #tpu.memory_space<vmem>>, vector<32x256xf32>
    %cst = arith.constant dense<0.000000e+00> : vector<8x256xf32>
    %6 = tpu.matmul %4, %5, %cst {dimension_numbers = #tpu.dot_dimension_numbers<[1], [0], [0], [1], [0, 0, 1, 1], [], []>} : vector<8x32xf32>, vector<32x256xf32>, vector<8x256xf32> -> vector<8x256xf32>
    %c0_5 = arith.constant 0 : index
    %c0_6 = arith.constant 0 : index
    %7 = vector.load %arg4[%c0_5, %c0_6] : memref<1x256xf32, #tpu.memory_space<vmem>>, vector<1x256xf32>
    %8 = vector.broadcast %7 : vector<1x256xf32> to vector<8x256xf32>
    %9 = arith.addf %6, %8 : vector<8x256xf32>
    %10 = vector.extract_strided_slice %9 {offsets = [0, 0], sizes = [8, 128], strides = [1, 1]} : vector<8x256xf32> to vector<8x128xf32>
    %11 = math.tanh %10 : vector<8x128xf32>
    %12 = vector.extract_strided_slice %9 {offsets = [0, 128], sizes = [8, 128], strides = [1, 1]} : vector<8x256xf32> to vector<8x128xf32>
    %13 = arith.negf %12 : vector<8x128xf32>
    %14 = math.exp %13 : vector<8x128xf32>
    %cst_7 = arith.constant 1.000000e+00 : f32
    %15 = vector.broadcast %cst_7 : f32 to vector<8x128xf32>
    %16 = arith.addf %15, %14 : vector<8x128xf32>
    %17 = arith.divf %15, %16 : vector<8x128xf32>
    %18 = arith.mulf %11, %17 : vector<8x128xf32>
    %c0_8 = arith.constant 0 : index
    %c0_9 = arith.constant 0 : index
    %19 = vector.load %arg5[%c0_8, %c0_9] : memref<4x128xf32, #tpu.memory_space<vmem>>, vector<4x128xf32>
    %cst_10 = arith.constant dense<0.000000e+00> : vector<4x8xf32>
    %20 = tpu.matmul %19, %18, %cst_10 {dimension_numbers = #tpu.dot_dimension_numbers<[1], [1], [0], [0], [0, 0, 1, 0], [], []>} : vector<4x128xf32>, vector<8x128xf32>, vector<4x8xf32> -> vector<4x8xf32>
    %c0_11 = arith.constant 0 : index
    %c0_12 = arith.constant 0 : index
    %21 = vector.load %arg6[%c0_11, %c0_12] : memref<4x1xf32, #tpu.memory_space<vmem>>, vector<4x1xf32>
    %22 = vector.broadcast %21 : vector<4x1xf32> to vector<4x8xf32>
    %23 = arith.addf %20, %22 : vector<4x8xf32>
    %c0_13 = arith.constant 0 : index
    %c0_14 = arith.constant 0 : index
    %c0_15 = arith.constant 0 : index
    %24 = vector.load %arg8[%c0_13, %c0_14, %c0_15] : memref<1x4x8xf32, #tpu.memory_space<vmem>>, vector<1x4x8xf32>
    %25 = vector.shape_cast %24 : vector<1x4x8xf32> to vector<4x8xf32>
    %26 = vector.shape_cast %23 : vector<4x8xf32> to vector<1x4x8xf32>
    tpu.vector_store %arg8[%c0_13, %c0_14, %c0_15], %26 {strides = array<i32>} : memref<1x4x8xf32, #tpu.memory_space<vmem>>, vector<1x4x8xf32>,
    %c0_16 = arith.constant 0 : index
    %c0_17 = arith.constant 0 : index
    %27 = vector.load %arg9[%c0_16, %c0_17] : memref<4x1xf32, #tpu.memory_space<vmem>>, vector<4x1xf32>
    %cst_18 = arith.constant dense<0xFF800000> : vector<4xf32>
    %28 = vector.multi_reduction <maximumf>, %23, %cst_18 [1] : vector<4x8xf32> to vector<4xf32>
    %29 = vector.shape_cast %28 : vector<4xf32> to vector<4x1xf32>
    %30 = arith.maximumf %27, %29 : vector<4x1xf32>
    %31 = arith.subf %27, %30 : vector<4x1xf32>
    %32 = math.exp %31 : vector<4x1xf32>
    %33 = vector.broadcast %30 : vector<4x1xf32> to vector<4x8xf32>
    %34 = arith.subf %23, %33 : vector<4x8xf32>
    %35 = math.exp %34 : vector<4x8xf32>
    %c0_19 = arith.constant 0 : index
    %c0_20 = arith.constant 0 : index
    %36 = vector.load %arg10[%c0_19, %c0_20] : memref<4x1xf32, #tpu.memory_space<vmem>>, vector<4x1xf32>
    %37 = arith.mulf %32, %36 : vector<4x1xf32>
    %cst_21 = arith.constant dense<0.000000e+00> : vector<4xf32>
    %38 = vector.multi_reduction <add>, %35, %cst_21 [1] : vector<4x8xf32> to vector<4xf32>
    %39 = vector.shape_cast %38 : vector<4xf32> to vector<4x1xf32>
    %40 = arith.addf %37, %39 : vector<4x1xf32>
    %c0_22 = arith.constant 0 : index
    %c0_23 = arith.constant 0 : index
    %41 = vector.load %arg10[%c0_22, %c0_23] : memref<4x1xf32, #tpu.memory_space<vmem>>, vector<4x1xf32>
    tpu.vector_store %arg10[%c0_22, %c0_23], %40 {strides = array<i32>} : memref<4x1xf32, #tpu.memory_space<vmem>>, vector<4x1xf32>,
    %c0_24 = arith.constant 0 : index
    %c0_25 = arith.constant 0 : index
    %42 = vector.load %arg11[%c0_24, %c0_25] : memref<4x32xf32, #tpu.memory_space<vmem>>, vector<4x32xf32>
    %43 = vector.broadcast %32 : vector<4x1xf32> to vector<4x32xf32>
    %44 = arith.mulf %43, %42 : vector<4x32xf32>
    %cst_26 = arith.constant dense<0.000000e+00> : vector<4x32xf32>
    %45 = tpu.matmul %35, %4, %cst_26 {dimension_numbers = #tpu.dot_dimension_numbers<[1], [0], [0], [1], [0, 0, 1, 1], [], []>} : vector<4x8xf32>, vector<8x32xf32>, vector<4x32xf32> -> vector<4x32xf32>
    %46 = arith.addf %44, %45 : vector<4x32xf32>
    %c0_27 = arith.constant 0 : index
    %c0_28 = arith.constant 0 : index
    %47 = vector.load %arg11[%c0_27, %c0_28] : memref<4x32xf32, #tpu.memory_space<vmem>>, vector<4x32xf32>
    tpu.vector_store %arg11[%c0_27, %c0_28], %46 {strides = array<i32>} : memref<4x32xf32, #tpu.memory_space<vmem>>, vector<4x32xf32>,
    %c0_29 = arith.constant 0 : index
    %c0_30 = arith.constant 0 : index
    %48 = vector.load %arg9[%c0_29, %c0_30] : memref<4x1xf32, #tpu.memory_space<vmem>>, vector<4x1xf32>
    tpu.vector_store %arg9[%c0_29, %c0_30], %30 {strides = array<i32>} : memref<4x1xf32, #tpu.memory_space<vmem>>, vector<4x1xf32>,
    %c0_i32_31 = arith.constant 0 : i32
    %49 = arith.cmpi eq, %arg1, %c0_i32_31 : i32
    %50 = arith.extui %49 : i1 to i32
    %c0_i32_32 = arith.constant 0 : i32
    %51 = arith.cmpi ne, %50, %c0_i32_32 : i32
    scf.if %51 {
      %c0_33 = arith.constant 0 : index
      %c0_34 = arith.constant 0 : index
      %52 = vector.load %arg10[%c0_33, %c0_34] : memref<4x1xf32, #tpu.memory_space<vmem>>, vector<4x1xf32>
      %53 = tpu.reciprocal %52 : vector<4x1xf32> -> vector<4x1xf32>
      %c0_35 = arith.constant 0 : index
      %c0_36 = arith.constant 0 : index
      %54 = vector.load %arg11[%c0_35, %c0_36] : memref<4x32xf32, #tpu.memory_space<vmem>>, vector<4x32xf32>
      %55 = vector.broadcast %53 : vector<4x1xf32> to vector<4x32xf32>
      %56 = arith.mulf %54, %55 : vector<4x32xf32>
      %c0_37 = arith.constant 0 : index
      %c0_38 = arith.constant 0 : index
      %c0_39 = arith.constant 0 : index
      %57 = vector.load %arg7[%c0_37, %c0_38, %c0_39] : memref<1x4x32xf32, #tpu.memory_space<vmem>>, vector<1x4x32xf32>
      %58 = vector.shape_cast %57 : vector<1x4x32xf32> to vector<4x32xf32>
      %59 = vector.shape_cast %56 : vector<4x32xf32> to vector<1x4x32xf32>
      tpu.vector_store %arg7[%c0_37, %c0_38, %c0_39], %59 {strides = array<i32>} : memref<1x4x32xf32, #tpu.memory_space<vmem>>, vector<1x4x32xf32>,
      %c0_40 = arith.constant 0 : index
      %c0_41 = arith.constant 0 : index
      %c0_42 = arith.constant 0 : index
      %60 = vector.load %arg8[%c0_40, %c0_41, %c0_42] : memref<1x4x8xf32, #tpu.memory_space<vmem>>, vector<1x4x8xf32>
      %61 = vector.shape_cast %60 : vector<1x4x8xf32> to vector<4x8xf32>
      %c0_43 = arith.constant 0 : index
      %c0_44 = arith.constant 0 : index
      %62 = vector.load %arg9[%c0_43, %c0_44] : memref<4x1xf32, #tpu.memory_space<vmem>>, vector<4x1xf32>
      %63 = vector.broadcast %62 : vector<4x1xf32> to vector<4x8xf32>
      %64 = arith.subf %61, %63 : vector<4x8xf32>
      %65 = math.exp %64 : vector<4x8xf32>
      %66 = vector.broadcast %53 : vector<4x1xf32> to vector<4x8xf32>
      %67 = arith.mulf %65, %66 : vector<4x8xf32>
      %c0_45 = arith.constant 0 : index
      %c0_46 = arith.constant 0 : index
      %c0_47 = arith.constant 0 : index
      %68 = vector.load %arg8[%c0_45, %c0_46, %c0_47] : memref<1x4x8xf32, #tpu.memory_space<vmem>>, vector<1x4x8xf32>
      %69 = vector.shape_cast %68 : vector<1x4x8xf32> to vector<4x8xf32>
      %70 = vector.shape_cast %67 : vector<4x8xf32> to vector<1x4x8xf32>
      tpu.vector_store %arg8[%c0_45, %c0_46, %c0_47], %70 {strides = array<i32>} : memref<1x4x8xf32, #tpu.memory_space<vmem>>, vector<1x4x8xf32>,
    } else {
    }
    return
  }
  func.func @transform_0(%arg0: i32, %arg1: i32) -> (i32, i32, i32) {
    %c0_i32 = arith.constant 0 : i32
    %c0_i32_0 = arith.constant 0 : i32
    return %arg0, %arg1, %c0_i32 : i32, i32, i32
  }
  func.func @transform_1(%arg0: i32, %arg1: i32) -> (i32, i32) {
    %c0_i32 = arith.constant 0 : i32
    %c0_i32_0 = arith.constant 0 : i32
    %c0_i32_1 = arith.constant 0 : i32
    return %c0_i32, %c0_i32_0 : i32, i32
  }
  func.func @transform_2(%arg0: i32, %arg1: i32) -> (i32, i32) {
    %c0_i32 = arith.constant 0 : i32
    %c0_i32_0 = arith.constant 0 : i32
    %c0_i32_1 = arith.constant 0 : i32
    return %c0_i32, %c0_i32_0 : i32, i32
  }
  func.func @transform_3(%arg0: i32, %arg1: i32) -> (i32, i32) {
    %c0_i32 = arith.constant 0 : i32
    %c0_i32_0 = arith.constant 0 : i32
    %c0_i32_1 = arith.constant 0 : i32
    return %c0_i32, %c0_i32_0 : i32, i32
  }
  func.func @transform_4(%arg0: i32, %arg1: i32) -> (i32, i32) {
    %c0_i32 = arith.constant 0 : i32
    %c0_i32_0 = arith.constant 0 : i32
    %c0_i32_1 = arith.constant 0 : i32
    return %c0_i32, %c0_i32_0 : i32, i32
  }
  func.func @transform_5(%arg0: i32, %arg1: i32) -> (i32, i32, i32) {
    %c0_i32 = arith.constant 0 : i32
    %c0_i32_0 = arith.constant 0 : i32
    %c0_i32_1 = arith.constant 0 : i32
    return %arg0, %c0_i32, %c0_i32_0 : i32, i32, i32
  }
  func.func @transform_6(%arg0: i32, %arg1: i32) -> (i32, i32, i32) {
    %c0_i32 = arith.constant 0 : i32
    %c0_i32_0 = arith.constant 0 : i32
    %c0_i32_1 = arith.constant 0 : i32
    return %arg0, %c0_i32, %c0_i32_0 : i32, i32, i32
  }
}

</mosaic_0001>

<bundles_post_ra>
// kernel: tpu_custom_call.1
= control target key start
LH: loop header
LB: loop body
LE: loop exit
PB: predicated region body
PF: predicated region fallthrough
CT: control target
= control target key end

     0   :  { %s1286_s0 = inlined_call_operand.hbm [shape: f32[2,8,32], index: 0, kind: input, shape index: {}]   ;;  %s1287_s1 = inlined_call_operand.hbm [shape: f32[32,256], index: 1, kind: input, shape index: {}]   ;;  %s1288_s2 = inlined_call_operand.hbm [shape: f32[1,256], index: 2, kind: input, shape index: {}]   ;;  %s1289_s3 = inlined_call_operand.vmem [shape: f32[4,128], index: 3, kind: input, shape index: {}]   ;;  %s1290_s4 = inlined_call_operand.vmem [shape: f32[4,1], index: 4, kind: input, shape index: {}]   ;;  %s1291_s5 = inlined_call_operand.hbm [shape: f32[2,4,32], index: 5, kind: output, shape index: {0}]   ;;  %s1292_s6 = inlined_call_operand.hbm [shape: f32[2,4,8], index: 6, kind: output, shape index: {1}]  }
   0x1   :  { %1293 = sst [smem:[#allocation18_spill]] %s1287_s1 }
   0x2   :  { %12 = vsyncpa [#allocation6], 0 }
   0x3   :  { %14 = vsyncpa [#allocation6 + $0x1], 0 }
   0x4   :  { %15 = vsyncpa [#allocation9], 0 }
   0x5   :  { %16 = vsyncpa [#allocation7], 0 }
   0x6   :  { %18 = vsyncpa [#allocation7 + $0x1], 0 }
   0x7   :  { %19 = vsyncpa [#allocation13], 0 }
   0x8   :  { %21 = vsyncpa [#allocation13 + $0x1], 0  ;;  %s1093_s21 = smov 0   ;;  %s1095_s22 = smov 0  }
   0x9   :  { %s1097_s23 = smov 0   ;;  %s1099_s24 = smov 0  }
   0xa   :  { %s1101_s25 = smov 0   ;;  %s1103_s26 = smov 0  }
   0xb LB: > { %s707_s27 = sadd.s32 4294967295, %s1049_s26   ;;  %p709_p0 = scmp.ge.s32.totalorder %s1049_s26, 1  ;;  %s1049_s26 = sphi %s1103_s26, %s27_s26   ;;  %s1045_s25 = sphi %s1101_s25, %s1304_s25   ;;  %s1041_s24 = sphi %s1099_s24, %s1303_s24   ;;  %s1037_s23 = sphi %s1097_s23, %s1302_s23   ;;  %s1033_s22 = sphi %s1095_s22, %s1301_s22   ;;  %s1029_s21 = sphi %s1093_s21, %s1300_s21  }
   0xc   : > { %p1127_p1 = scmp.eq.s32.totalorder %s707_s27, 0  ;;  %p208_p2 = scmp.lt.s32.totalorder %s1049_s26, 3 }
   0xd   : > { %s1295_s1 = sld [smem:[#allocation18_spill]]  ;;  %s1051_s9 = smov [#allocation8]  }
   0xe   : > { %p1135_p3 = pnand %p709_p0, %p208_p2  ;;  %s221_s10 = sshll.u32 %s1051_s9, 4  ;;  %s222_s10 = int_to_ptr.vmem [resolvable:$true] %s221_s10 }
   0xf   : > { %p712_p6 = scmp.ge.s32.totalorder %s1049_s26, 2  ;;  %s234_s13 = sshll.u32 %s1288_s2, 4  ;;  %s235_s13 = int_to_ptr.hbm [resolvable:$true] %s234_s13 }
  0x10   : > { %p745_p4 = pneg %p1135_p3  ;;  %s1052_s14 = smov 256  }
  0x11   : > { %s1053_s15 = smov 16   ;;  %s1054_s16 = smov [#allocation10]  }
  0x12   : > { %p746_p5 = pnand %p745_p4, %p1127_p1  ;;  %s236_s17 = sshll.u32 %s1054_s16, 4  ;;  %s237_s17 = int_to_ptr.vmem [resolvable:$true] %s236_s17 }
  0x13   : > { %s219_s7 = sshll.u32 %s1295_s1, 4  ;;  %s39_s18 = sadd.s32 1, %s1045_s25  ;;  %s220_s7 = int_to_ptr.hbm [resolvable:$true] %s219_s7 }
  0x14   : > { %748 = dma.hbm_to_vmem [thread:$0]  (!%p746_p5), %s220_s7, 1024, %s222_s10, [#allocation9], %s1052_s14, %s1052_s14, %s1053_s15  }
  0x15   : > { %751 = dma.hbm_to_vmem [thread:$0]  (!%p746_p5), %s235_s13, 32, %s237_s17, [#allocation9]  }
  0x16   : > { %s708_s19 = sadd.s32 4294967294, %s1049_s26   ;;  %p41_p7 = scmp.ge.s32.totalorder %s39_s18, 2 }
  0x17   : > { %s48_s20 = sadd.s32 1, %s1037_s23  ;;  %p55_p8 = scmp.ne.s32.totalorder %s1037_s23, %s1033_s22 }
  0x18   : > { %s1306_s18 = smov (%p41_p7, %s39_s18), 0  ;;  %p56_p9 = scmp.eq.s32.totalorder %s1049_s26, 0 }
  0x19   : > { %p61_p10 = scmp.ne.s32.totalorder %s1033_s22, %s1029_s21  ;;  %s43_s29 = ssub.s32 %s1045_s25, %s1306_s18 }
  0x1a   : > { %p169_p11 = scmp.eq.s32.totalorder %s707_s27, 1  ;;  %p46_p12 = scmp.eq.s32.totalorder %s43_s29, 0 }
  0x1b   : > { %p1163_p13 = por %p1127_p1, %p61_p10  ;;  %p175_p2 = scmp.eq.s32.totalorder %s708_s19, 1 }
  0x1c   : > { %p1167_p0 = por %p169_p11, %p55_p8  ;;  %p57_p4 = por %p56_p9, %p55_p8 }
  0x1d   : > { %s1172_s9 = scalar_select %p46_p12, %s1037_s23, %s48_s20  }
  0x1e   : > { %p1174_p5 = por %p175_p2, %p61_p10  ;;  %s253_s11 = sand.u32 1, %s1037_s23  }
  0x1f   : > { %s714_s27 = sshll.u32 %s1045_s25, 3  ;;  %p765_p7 = scmp.lt.s32.totalorder %s1049_s26, 2 }
  0x20   : > { %s713_s12 = sshll.u32 %s253_s11, 3  ;;  %s262_s15 = scalar_lea.hbm %s1286_s0, %s714_s27 }
  0x21   : > { %s264_s16 = sshll.u32 %s262_s15, 4  ;;  %s257_s17 = scalar_lea.vmem [#allocation5], %s713_s12  ;;  %s265_s16 = int_to_ptr.hbm [resolvable:$true] %s264_s16 }
  0x22   : > { %s266_s29 = sshll.u32 %s257_s17, 4  ;;  %p753_p11 = pnand %p765_p7, %p57_p4  ;;  %s267_s29 = int_to_ptr.vmem [resolvable:$true] %s266_s29 }
  0x23   : > { %s254_s19 = scalar_lea.sflag [#allocation6], %s253_s11  ;;  %275 = sbr.rel (%p1135_p3) target bundleno = 844 (0x34c), region = 40 }
  0x24   : > { %755 = dma.hbm_to_vmem [thread:$0]  (!%p753_p11), %s265_s16, 128, %s267_s29, %s254_s19  }
  0x25   : > { %s1187_s20 = sand.u32 (!%p1135_p3), 1, %s1033_s22  }
  0x26   : > { %s716_s1 = sshll.u32 (!%p1135_p3), %s1187_s20, 3  ;;  %s278_s13 = scalar_lea.sflag (!%p1135_p3), [#allocation6], %s1187_s20 }
  0x27   : > { %s281_s27 = scalar_lea.vmem (!%p1135_p3), [#allocation5], %s716_s1 }
  0x28   : > { %1012 = dma.done.wait (%p1163_p13), %s278_s13, 128  }
  0x29   : > { %1014 = vsyncadd (%p1163_p13), %s278_s13, 4294967168 }
  0x2a   : > { %1016 = dma.done.wait (%p1127_p1), [#allocation9], 1056  }
  0x2b   : > { %1018 = vsyncadd (%p1127_p1), [#allocation9], 4294966240  ;;  %v343_v0 = vld [vmem:[#allocation8 + $0x38] sm:$0xff]  ;;  %v341_v1 = vld [vmem:[#allocation8 + $0x28] sm:$0xff]  ;;  %vm350_vm0 = vcmask 261120   ;;  %v1055_v15 = vmov 0  }
  0x2c   : > { %386 = vmatpush.msra.mxu1 %v343_v0  ;;  %v335_v2 = vld [vmem:[%s281_s27] sm:$0xff]  ;;  %v340_v5 = vld [vmem:[#allocation8 + $0x20] sm:$0xff]  ;;  %v337_v7 = vld [vmem:[#allocation8 + $0x8] sm:$0xff]  ;;  %824 = vset.pattern.permute.xlu0 %v1055_v15  ;;  %vm330_vm5 = vcmask 3072   ;;  %v1056_v34 = vmov -1e+30  }
  0x2d   : > { %v342_v3 = vld [vmem:[#allocation8 + $0x30] sm:$0xff]  ;;  %v339_v4 = vld [vmem:[#allocation8 + $0x18] sm:$0xff]  ;;  %494 = vmatpush.msra.mxu3 %v335_v2  ;;  %v336_v8 = vld [vmem:[#allocation8] sm:$0xff]  ;;  %825 = vset.pattern.permute.xlu1 %v1055_v15  ;;  %331 = vst.msk [vmem:[#allocation2] sm:$0xf] %vm330_vm5, %v1056_v34  ;;  %s719_s11 = sshll.u32 %s1187_s20, 2 }
  0x2e   : > { %366 = vmatpush.msra.mxu0 %v342_v3  ;;  %387 = vmatpush.msra.mxu1 %v341_v1  ;;  %v338_v6 = vld [vmem:[#allocation8 + $0x10] sm:$0xff]  ;;  %v344_v9 = vld [vmem:[#allocation10] sm:$0x3]  ;;  %v416_v14 = vld [vmem:[%s1290_s4] sm:$0xf]  ;;  %vm442_vm6 = vcmask 60416  }
  0x2f   : > { %v347_v10 = vperm.slane %v344_v9, 1  ;;  %419 = vperm.xlu0 %824, %v416_v14   ;;  %826 = vset.pattern.permute.xlu2 %v1055_v15  ;;  %v346_v18 = vperm.slane %v344_v9, 0  ;;  %v415_v33 = vld [vmem:[%s1289_s3] sm:$0xf]  ;;  %s1210_s12 = scalar_lea.vmem [#allocation12], %s719_s11  ;;  %v1057_v39 = vmov 0.0  }
  0x30   : > { %367 = vmatpush.msra.mxu0 %v340_v5  ;;  %388 = vmatpush.msra.mxu1 %v339_v4  ;;  %332 = vst.msk [vmem:[#allocation3] sm:$0xf] %vm330_vm5, %v1057_v39  ;;  %vm333_vm7 = vcmask 257024   ;;  %vm475_vm8 = vcmask 64512   ;;  %s727_s14 = sshll.u32 %s1041_s24, 2  ;;  %s573_s27 = sshll.u32 %s1210_s12, 4  ;;  %s574_s27 = int_to_ptr.vmem [resolvable:$true] %s573_s27 }
  0x31   : > { %334 = vst.msk [vmem:[#allocation4] sm:$0xf] %vm333_vm7, %v1057_v39  ;;  %s571_s17 = scalar_lea.hbm %s1292_s6, %s727_s14  ;;  %s557_s13 = scalar_lea.hbm %s1291_s5, %s727_s14 }
  0x32   : > { %368 = vmatpush.msra.mxu0 %v338_v6  ;;  %389 = vmatpush.msra.mxu1 %v337_v7  ;;  %s575_s1 = sshll.u32 %s571_s17, 4  ;;  %s318_s28 = scalar_lea.vmem [#allocation11], %s719_s11  ;;  %s576_s1 = int_to_ptr.hbm [resolvable:$true] %s575_s1 }
  0x33   : > { %722 = vmatmul.msk.f32.vlgmr.msra.gmra.mxu1 %vm350_vm0, %v335_v2  ;;  %s559_s8 = sshll.u32 %s318_s28, 4  ;;  %s561_s30 = sshll.u32 %s557_s13, 4  ;;  %s1231_s8 = int_to_ptr.vmem [resolvable:$true] %s559_s8  ;;  %s1233_s30 = int_to_ptr.hbm [resolvable:$true] %s561_s30 }
  0x34   : > { %369 = vmatpush.msra.mxu0 %v336_v8  ;;  %v444_v40 = vld [vmem:[#allocation2] sm:$0xf]  ;;  %s547_s24 = scalar_lea.sflag [#allocation13], %s1187_s20  ;;  %s945_s11 = sshra.s32 %s576_s1, 4  ;;  %s946_s11 = int_to_ptr.hbm [resolvable:$true] %s945_s11 }
  0x35   : > { %721 = vmatmul.msk.f32.vlgmr.msra.gmra.mxu0 %vm350_vm0, %v335_v2  ;;  %s947_s14 = scalar_lea.hbm %s946_s11, 4  ;;  %s951_s17 = scalar_lea.hbm %s1292_s6, 8 }
  0x36   : > { %p948_p1 = scmp.ne.s32.totalorder %s946_s11, %s947_s14  ;;  %p952_p9 = scmp.lt.s32.totalorder %s946_s11, %s1292_s6 }
  0x37   : > { %v460_v52 = vld [vmem:[#allocation3] sm:$0xf]  ;;  %p953_p10 = scmp.lt.s32.totalorder %s951_s17, %s947_s14 }
  0x38   : > { %v468_v57 = vld [vmem:[#allocation4] sm:$0xf]  ;;  %p949_p3 = pnand %p948_p1, %p1167_p0 }
  0x39   : > { %p954_p12 = por %p953_p10, %p952_p9 }
  0x3a   : > { %p950_p8 = pneg %p949_p3 }
  0x3c   : > { %p955_p13 = pnand %p954_p12, %p950_p8 }
  0xa1   : > { %v420_v35 = vpop.permute.xlu0 %419 }
  0xb0   : > { %v391_v11 = vpop.f32.mrf.mxu1 }
  0xb1   : > { %v392_v12 = vadd.f32 %v391_v11, %v347_v10 }
  0xb2   : > { %v371_v19 = vpop.f32.mrf.mxu0 }
  0xb3   : > { %v723_v13 = vmul.f32 -1.442695, %v392_v12  ;;  %v372_v20 = vadd.f32 %v371_v19, %v346_v18 }
  0xb5   : > { %827 = vpow2.f32 %v723_v13 }
  0xbb   : > { %v828_v16 = vpop.eup %827 }
  0xbc   : > { %v398_v17 = vadd.f32 1.0, %v828_v16 }
  0xbe   : > { %829 = vrcp.f32 %v398_v17  ;;  %v410_v24 = vand.u32 2147483648, %v398_v17  ;;  %v408_v26 = vand.u32 2147483647, %v398_v17  ;;  %vm404_vm2 = vweird.f32 %v398_v17 }
  0xbf   : > { %831 = vtanh.f32 %v372_v20 }
  0xc0   : > { %v411_v29 = vor.u32 1.1754944e-38, %v410_v24  ;;  %vm409_vm4 = vcmp.eq.f32.partialorder %v408_v26, 8.507059e+37 }
  0xc4   : > { %v830_v21 = vpop.eup %829 }
  0xc5   : > { %v400_v22 = vmul.f32 %v830_v21, %v398_v17  ;;  %vm405_vm1 = vweird.f32 %v830_v21  ;;  %v832_v28 = vpop.eup %831 }
  0xc6   : > { %vm406_vm3 = vmor %vm404_vm2, %vm405_vm1 }
  0xc7   : > { %v401_v23 = vsub.f32 1.0, %v400_v22 }
  0xc9   : > { %v402_v25 = vmul.f32 %v830_v21, %v401_v23 }
  0xcb   : > { %v403_v27 = vadd.f32 %v830_v21, %v402_v25 }
  0xcd   : > { %v407_v30 = vsel %vm406_vm3, %v830_v21, %v403_v27 }
  0xce   : > { %v412_v31 = vsel %vm409_vm4, %v411_v29, %v407_v30 }
  0xcf   : > { %v414_v32 = vmul.f32 %v832_v28, %v412_v31 }
  0xd1   : > { %437 = vmatpush.xpose.msra.mxu2 %v414_v32 }
  0xd4   : > { %438 = vmatmul.f32.vlgmr.msra.gmra.mxu2 %v415_v33 }
 0x157   : > { %v439_v36 = vpop.f32.mrf.mxu2 }
 0x158   : > { %v440_v37 = vadd.f32 %v439_v36, %v420_v35 }
 0x15a   : > { %v445_v38 = vsel %vm442_vm6, %v440_v37, -inf  ;;  %443 = vst.msk [vmem:[%s1210_s12] sm:$0xf] %vm442_vm6, %v440_v37 }
 0x15b   : > { %446 = vmax.xlane.f32.xlu0 %v445_v38 }
 0x161   : > { %v529_v9 = vld [vmem:[%s1210_s12] sm:$0xf] }
 0x1ce   : > { %v447_v41 = vpop.xlane.xlu0 %446 }
 0x1cf   : > { %v448_v42 = vmax.f32 %v444_v40, %v447_v41 }
 0x1d1   : > { %v449_v43 = vsub.f32 %v444_v40, %v448_v42  ;;  %502 = vst.msk [vmem:[#allocation2] sm:$0xf] %vm330_vm5, %v448_v42  ;;  %454 = vperm.xlu1 %825, %v448_v42  }
 0x1d3   : > { %v450_v44 = vmul.f32 1.442695, %v449_v43 }
 0x1d5   : > { %833 = vpow2.f32 %v450_v44 }
 0x1d8   : > { %v530_v46 = vld [vmem:[#allocation2] sm:$0xf] }
 0x1db   : > { %v834_v45 = vpop.eup %833 }
 0x1dc   : > { %471 = vperm.xlu2 %826, %v834_v45   ;;  %v461_v53 = vmul.f32 %v834_v45, %v460_v52 }
 0x1e4   : > { %533 = vperm.xlu2 %826, %v530_v46  }
 0x236   : > { %v472_v58 = vpop.permute.xlu2 %471 }
 0x237   : > { %v474_v59 = vmul.f32 %v472_v58, %v468_v57 }
 0x23e   : > { %v534_v8 = vpop.permute.xlu2 %533 }
 0x23f   : > { %v536_v10 = vsub.f32 %v529_v9, %v534_v8 }
 0x241   : > { %v537_v11 = vmul.f32 1.442695, %v536_v10 }
 0x243   : > { %v455_v47 = vpop.permute.xlu1 %454 }
 0x244   : > { %v457_v48 = vsub.f32 %v440_v37, %v455_v47 }
 0x246   : > { %v458_v49 = vmul.f32 1.442695, %v457_v48 }
 0x248   : > { %835 = vpow2.f32 %v458_v49 }
 0x24e   : > { %v836_v50 = vpop.eup %835 }
 0x24f   : > { %724 = vmatmul.msk.f32.vlgmr.msra.gmra.mxu3 %vm475_vm8, %v836_v50  ;;  %v462_v51 = vsel %vm442_vm6, %v836_v50, 0.0 }
 0x250   : > { %463 = vadd.xlane.f32.xlu1 %v462_v51 }
 0x2c3   : > { %v464_v54 = vpop.xlane.xlu1 %463 }
 0x2c4   : > { %v465_v55 = vadd.f32 %v464_v54, %v461_v53 }
 0x2c6   : > { %467 = vst.msk [vmem:[#allocation3] sm:$0xf] %vm330_vm5, %v465_v55 }
 0x2cd   : > { %v506_v56 = vld [vmem:[#allocation3] sm:$0xf] }
 0x2ce   : > { %837 = vrcp.f32 %v506_v56  ;;  %v518_v1 = vand.u32 2147483648, %v506_v56  ;;  %v516_v3 = vand.u32 2147483647, %v506_v56  ;;  %vm512_vm10 = vweird.f32 %v506_v56 }
 0x2cf   : > { %839 = vpow2.f32 %v537_v11 }
 0x2d0   : > { %v519_v5 = vor.u32 1.1754944e-38, %v518_v1  ;;  %vm517_vm12 = vcmp.eq.f32.partialorder %v516_v3, 8.507059e+37 }
 0x2d2   : > { %v496_v60 = vpop.f32.mrf.mxu3 }
 0x2d3   : > { %v499_v61 = vadd.f32 %v496_v60, %v474_v59 }
 0x2d4   : > { %v838_v62 = vpop.eup %837 }
 0x2d5   : > { %501 = vst.msk [vmem:[#allocation4] sm:$0xf] %vm333_vm7, %v499_v61  ;;  %v508_v63 = vmul.f32 %v838_v62, %v506_v56  ;;  %vm513_vm9 = vweird.f32 %v838_v62  ;;  %v840_v12 = vpop.eup %839 }
 0x2d6   : > { %vm514_vm11 = vmor %vm512_vm10, %vm513_vm9 }
 0x2d7   : > { %v509_v0 = vsub.f32 1.0, %v508_v63 }
 0x2d9   : > { %v510_v2 = vmul.f32 %v838_v62, %v509_v0 }
 0x2db   : > { %v511_v4 = vadd.f32 %v838_v62, %v510_v2 }
 0x2dc   : > { %v521_v13 = vld [vmem:[#allocation4] sm:$0xf] }
 0x2dd   : > { %v515_v6 = vsel %vm514_vm11, %v838_v62, %v511_v4 }
 0x2de   : > { %v520_v7 = vsel %vm517_vm12, %v519_v5, %v515_v6 }
 0x2df   : > { %524 = vperm.xlu2 %826, %v520_v7  }
 0x339   : > { %v525_v14 = vpop.permute.xlu2 %524 }
 0x33a   : > { %v527_v15 = vmul.f32 %v525_v14, %v521_v13  ;;  %v539_v16 = vmul.f32 %v840_v12, %v525_v14 }
 0x33c   : > { %540 = vst.msk [vmem:[%s1210_s12] sm:$0xf] %vm442_vm6, %v539_v16 }
 0x33d   : > { %528 = vst.msk [vmem:[%s318_s28] sm:$0xf] %vm333_vm7, %v527_v15 }
 0x33e   : > { %958 = shalt.err (!%p955_p13)
}
 0x33f   : > { %742 = dma.vmem_to_hbm [thread:$0]  (%p1167_p0), %s574_s27, 64, %s576_s1, %s547_s24  }
 0x340   : > { %s542_s12 = scalar_lea.sflag [#allocation7], %s1187_s20  ;;  %s973_s13 = sshra.s32 %s1233_s30, 4  ;;  %s974_s13 = int_to_ptr.hbm [resolvable:$true] %s973_s13 }
 0x341   : > { %s975_s28 = scalar_lea.hbm %s974_s13, 4  ;;  %s979_s14 = scalar_lea.hbm %s1291_s5, 8 }
 0x342   : > { %p976_p2 = scmp.ne.s32.totalorder %s974_s13, %s975_s28  ;;  %p980_p11 = scmp.lt.s32.totalorder %s974_s13, %s1291_s5 }
 0x343   : > { %p981_p1 = scmp.lt.s32.totalorder %s979_s14, %s975_s28 }
 0x344   : > { %p977_p4 = pnand %p976_p2, %p1167_p0 }
 0x345   : > { %p982_p3 = por %p981_p1, %p980_p11 }
 0x346   : > { %p978_p7 = pneg %p977_p4 }
 0x348   : > { %p983_p8 = pnand %p982_p3, %p978_p7 }
 0x34a   : > { %986 = shalt.err (!%p983_p8)
}
 0x34b   : > { %741 = dma.vmem_to_hbm [thread:$0]  (%p1167_p0), %s1231_s8, 64, %s1233_s30, %s542_s12  }
 0x34c PF: > { %s587_s20 = sand.u32 1, %s1029_s21   ;;  %p757_p9 = pnand %p712_p6, %p1174_p5 }
 0x34d   : > { %s588_s27 = scalar_lea.sflag [#allocation7], %s587_s20 }
 0x34e   : > { %p758_p10 = pneg %p757_p9 }
 0x350   : > { %1020 = dma.done.wait (%p758_p10), %s588_s27, 64  }
 0x351   : > { %1022 = vsyncadd (%p758_p10), %s588_s27, 4294967232  ;;  %s598_s1 = scalar_lea.sflag [#allocation13], %s587_s20 }
 0x352   : > { %1024 = dma.done.wait (%p758_p10), %s598_s1, 64  }
 0x353   : > { %1026 = vsyncadd (%p758_p10), %s598_s1, 4294967232  ;;  %s27_s26 = sadd.s32 1, %s1049_s26   ;;  %s1300_s21 = smov %s1033_s22 }
 0x354   : > { %p24_p12 = scmp.ge.s32.totalorder %s27_s26, 4   ;;  %s1301_s22 = smov %s1037_s23 }
 0x355   : > { %s1302_s23 = smov %s1172_s9  ;;  %s1303_s24 = smov %s1045_s25 }
 0x356   : > { %s1304_s25 = smov %s1306_s18  ;;  %26 = sbr.rel (!%p24_p12) target bundleno = 11 (0xb), region = 118 }
 0x35b   :  { %604 = vsyncpa [#allocation6], 1 }
 0x35c   :  { %606 = vsyncpa [#allocation6 + $0x1], 1 }
 0x35d   :  { %607 = vsyncpa [#allocation9], 1 }
 0x35e   :  { %608 = vsyncpa [#allocation7], 1 }
 0x35f   :  { %610 = vsyncpa [#allocation7 + $0x1], 1 }
 0x360   :  { %611 = vsyncpa [#allocation13], 1 }
 0x361   :  { %613 = vsyncpa [#allocation13 + $0x1], 1 }

</bundles_post_ra>
